<compile_context>
chip_gen: v5e
topology: v5e:2x2
jax: 0.10.0
libtpu: 0.0.40
codegen_flags: <defaults>
</compile_context>

<pallas_src>
import jax
import jax.numpy as jnp
from jax.experimental import pallas as pl
from jax.experimental.pallas import tpu as pltpu


def _round_up(x, m):
    return ((x + m - 1) // m) * m


def _cdiv(a, b):
    return -(-a // b)


def att_kernel(maskadd_ref, enc_ref, ence_ref, out_ref, esum_ref):
    # Block shapes:
    #   maskadd_ref (Bb, L, 1)    f32     additive term (1 - mask_x) * 1e-10
    #   enc_ref     (Bb, L, D)    native  (resident across the Le axis)
    #   ence_ref    (Bb, Tle, D)  native  (streamed along the Le axis)
    #   out_ref     (Bb, L, D)    native  (written on the last Le step)
    #   esum_ref    (Bb, 1, D)    f32     scratch: column sum of encoder_e over Le
    j = pl.program_id(1)

    @pl.when(j == 0)
    def _():
        esum_ref[...] = jnp.zeros_like(esum_ref)

    # esum[b, 0, d] += sum_e encoder_e[b, e, d]   (f32 accumulation)
    esum_ref[...] += jnp.sum(ence_ref[...], axis=1, keepdims=True, dtype=jnp.float32)

    @pl.when(j == pl.num_programs(1) - 1)
    def _():
        enc = enc_ref[...]                                    # native dtype
        esum = esum_ref[...].astype(enc.dtype)                # (Bb, 1, D)

        # sumL[b, l] = sum_d enc[b,l,d] * esum[b,0,d]
        #            == row-sum of (encode @ encoder_e^T) without materializing [L, Le].
        sumL = jnp.sum(enc * esum, axis=-1, keepdims=True,
                       dtype=jnp.float32)                     # (Bb, L, 1)
        sumL = sumL + maskadd_ref[...]                        # additive mask term

        sumLmax = jnp.max(sumL, axis=1, keepdims=True)        # (Bb, 1, 1)
        # out = enc * (sumL / sumLmax) + enc == enc * (1 + sumL / sumLmax)
        scale = 1.0 + sumL * pl.reciprocal(sumLmax, approx=False)
        out_ref[...] = (enc * scale.astype(enc.dtype)).astype(out_ref.dtype)


def att_forward(mask_x, mask_e, encode, encoder_e, *,
                vmem_budget_bytes=None, min_batch_steps=4):
    """mask_x: [B, L] (bool/float), mask_e: [B, Le] (unused, kept for parity),
    encode: [B, L, D], encoder_e: [B, Le, D]  ->  [B, L, D] in encode's dtype."""
    del mask_e  # unused in the reference forward pass
    B, L, D = encode.shape
    Be, Le, De = encoder_e.shape
    assert B == Be and D == De
    out_dtype = encode.dtype

    # ---- generation-aware VMEM budget / ceiling -------------------------------
    try:
        vmem_cap = int(pltpu.get_tpu_info().vmem_capacity_bytes)
    except Exception:
        vmem_cap = 64 << 20                      # conservative (v7x-sized)
    if vmem_budget_bytes is None:
        # ~48 MiB on 128 MiB parts (v5e/v6e), ~28 MiB on 64 MiB parts (v7x)
        vmem_budget_bytes = (48 << 20) if vmem_cap >= (96 << 20) else (28 << 20)

    enc_sz = jnp.dtype(encode.dtype).itemsize
    ence_sz = jnp.dtype(encoder_e.dtype).itemsize
    out_sz = jnp.dtype(out_dtype).itemsize
    Dp = _round_up(D, 128)
    Lp = _round_up(L, 8)

    def step_bytes(bb, tle):
        tlp = _round_up(tle, 8)
        enc_blk = bb * Lp * Dp * enc_sz
        ence_blk = bb * tlp * Dp * ence_sz
        out_blk = bb * Lp * Dp * out_sz
        mask_blk = bb * Lp * 128 * 4             # (L,1) tile pads to 128 lanes
        dbuf = 2 * (enc_blk + ence_blk + out_blk + mask_blk)   # double-buffered streams
        scratch = bb * 8 * Dp * 4                # esum accumulator (sublane-padded)
        temps = bb * Lp * Dp * 4 + bb * tlp * Dp * 4           # f32 compute temporaries
        return dbuf + scratch + temps

    # ---- batch-block selection: keep >= min(B, 4) batch steps for pipelining
    # and so the "parallel" batch axis can shard across v7x's two TensorCores.
    min_steps = max(1, min(B, min_batch_steps))
    bb_cap = _cdiv(B, min_steps)
    bb = 1
    for cand in range(bb_cap, 0, -1):
        if step_bytes(cand, Le) <= vmem_budget_bytes:
            bb = cand
            break

    # ---- Le tiling (reduction axis), only if a single encoder block can't fit.
    tile_le = Le
    if step_bytes(bb, Le) > vmem_budget_bytes:
        tile_le = _round_up(Le, 8)
        while tile_le > 8 and step_bytes(bb, tile_le) > vmem_budget_bytes:
            tile_le = max(8, _round_up(tile_le // 2, 8))
    if tile_le >= Le:
        tile_le = Le
        n_le = 1
    else:
        n_le = _cdiv(Le, tile_le)
        pad = n_le * tile_le - Le
        if pad:
            # zero rows contribute nothing to the encoder column sum
            encoder_e = jnp.pad(encoder_e, ((0, 0), (0, pad), (0, 0)))

    n_b = _cdiv(B, bb)
    grid = (n_b, n_le)

    # Precompute the additive mask term once, shaped [B, L, 1] (f32).
    maskadd = ((1.0 - mask_x.astype(jnp.float32)) * jnp.float32(1e-10)).reshape(B, L, 1)

    # vmem limit: single-counted working set + slack, clamped below physical VMEM.
    sb = step_bytes(bb, tile_le)
    vmem_ceiling = min(int(vmem_cap * 0.85), 100 << 20)
    vmem_limit = int(min(vmem_ceiling, max(32 << 20, sb + (4 << 20))))

    bytes_accessed = (B * L * D * enc_sz + B * Le * D * ence_sz
                      + B * L * D * out_sz + B * L * 4)
    cost = pl.CostEstimate(flops=int(B * (2 * Le * D + 3 * L * D)),
                           transcendentals=0,
                           bytes_accessed=int(bytes_accessed))

    return pl.pallas_call(
        att_kernel,
        out_shape=jax.ShapeDtypeStruct((B, L, D), out_dtype),
        grid_spec=pltpu.PrefetchScalarGridSpec(
            num_scalar_prefetch=0,
            grid=grid,
            in_specs=[
                pl.BlockSpec((bb, L, 1), lambda i, j: (i, 0, 0)),
                pl.BlockSpec((bb, L, D), lambda i, j: (i, 0, 0)),
                pl.BlockSpec((bb, tile_le, D), lambda i, j: (i, j, 0)),
            ],
            out_specs=pl.BlockSpec((bb, L, D), lambda i, j: (i, 0, 0)),
            scratch_shapes=[pltpu.VMEM((bb, 1, D), jnp.float32)],
        ),
        compiler_params=pltpu.CompilerParams(
            dimension_semantics=("parallel", "arbitrary"),
            vmem_limit_bytes=vmem_limit,
        ),
        cost_estimate=cost,
    )(maskadd, encode, encoder_e)


def att_reference(mask_x, mask_e, encode, encoder_e):
    """Pure-JAX reference mirroring the PyTorch forward exactly (LL then row-sum)."""
    del mask_e
    trans_e = jnp.swapaxes(encoder_e, 1, 2)                 # [B, D, Le]
    LL = jnp.einsum('bld,bde->ble', encode.astype(jnp.float32),
                    trans_e.astype(jnp.float32))            # [B, L, Le]
    sumL = jnp.sum(LL, axis=-1)                             # [B, L]
    maskx = mask_x.astype(jnp.float32)
    sumL = sumL + (1.0 - maskx) * jnp.float32(1e-10)
    sumLmax = jnp.max(sumL, axis=-1, keepdims=True)         # [B, 1]
    norma = sumL / sumLmax                                  # [B, L]
    return (encode.astype(jnp.float32) * norma[..., None]
            + encode.astype(jnp.float32)).astype(encode.dtype)


if __name__ == "__main__":
    # Small shapes: batch=2, max_len=8, max_len_e=8, 2*hidden=32 (hidden=16)
    B, L, Le, D = 2, 8, 8, 32

    key = jax.random.PRNGKey(0)
    k1, k2 = jax.random.split(key, 2)

    encode = jax.random.normal(k1, (B, L, D), dtype=jnp.float32)
    encoder_e = jax.random.normal(k2, (B, Le, D), dtype=jnp.float32)

    # Boolean source masks (True = valid token), with a few padding positions.
    lengths = jnp.array([L, L - 3], dtype=jnp.int32)
    mask_x = (jnp.arange(L)[None, :] < lengths[:, None])                      # [B, L] bool
    mask_e = (jnp.arange(Le)[None, :] < jnp.array([Le, Le - 2])[:, None])     # unused

    out = att_forward(mask_x, mask_e, encode, encoder_e)
    out = jax.block_until_ready(out)

    ref = att_reference(mask_x, mask_e, encode, encoder_e)
    assert out.shape == (B, L, D)
    # Reassociated reduction (colsum-first) differs from LL-then-sum only at ulp level.
    assert jnp.allclose(out, ref, atol=1e-3, rtol=1e-3), "mismatch vs reference"

    print("KERNEL_OK")
</pallas_src>

<mosaic_0001>
module attributes {stable_mosaic.version = 11 : i64} {
  func.func @att_kernel(%arg0: i32, %arg1: i32, %arg2: memref<1x8x1xf32, #tpu.memory_space<vmem>>, %arg3: memref<1x8x32xf32, #tpu.memory_space<vmem>>, %arg4: memref<1x8x32xf32, #tpu.memory_space<vmem>>, %arg5: memref<1x8x32xf32, #tpu.memory_space<vmem>>, %arg6: memref<1x1x32xf32, #tpu.memory_space<vmem>>) attributes {dimension_semantics = [#tpu.dimension_semantics<parallel>, #tpu.dimension_semantics<arbitrary>], iteration_bounds = array<i64: 2, 1>, scalar_prefetch = 0 : i64, scratch_operands = 1 : i64, tpu.core_type = #tpu.core_type<tc>, window_params = [{transform_indices = @transform_0, window_bounds = array<i64: 1, 8, 1>}, {transform_indices = @transform_1, window_bounds = array<i64: 1, 8, 32>}, {transform_indices = @transform_2, window_bounds = array<i64: 1, 8, 32>}, {transform_indices = @transform_3, window_bounds = array<i64: 1, 8, 32>}]} {
    %c0_i32 = arith.constant 0 : i32
    %0 = arith.cmpi eq, %arg1, %c0_i32 : i32
    %1 = arith.extui %0 : i1 to i32
    %c0_i32_0 = arith.constant 0 : i32
    %2 = arith.cmpi ne, %1, %c0_i32_0 : i32
    scf.if %2 {
      %cst_11 = arith.constant 0.000000e+00 : f32
      %12 = vector.broadcast %cst_11 : f32 to vector<1x1x32xf32>
      %c0_12 = arith.constant 0 : index
      %c0_13 = arith.constant 0 : index
      %c0_14 = arith.constant 0 : index
      %13 = vector.load %arg6[%c0_12, %c0_13, %c0_14] : memref<1x1x32xf32, #tpu.memory_space<vmem>>, vector<1x1x32xf32>
      tpu.vector_store %arg6[%c0_12, %c0_13, %c0_14], %12 {strides = array<i32>} : memref<1x1x32xf32, #tpu.memory_space<vmem>>, vector<1x1x32xf32>,
    } else {
    }
    %c0 = arith.constant 0 : index
    %c0_1 = arith.constant 0 : index
    %c0_2 = arith.constant 0 : index
    %3 = vector.load %arg6[%c0, %c0_1, %c0_2] : memref<1x1x32xf32, #tpu.memory_space<vmem>>, vector<1x1x32xf32>
    %c0_3 = arith.constant 0 : index
    %c0_4 = arith.constant 0 : index
    %c0_5 = arith.constant 0 : index
    %4 = vector.load %arg4[%c0_3, %c0_4, %c0_5] : memref<1x8x32xf32, #tpu.memory_space<vmem>>, vector<1x8x32xf32>
    %cst = arith.constant dense<0.000000e+00> : vector<1x32xf32>
    %5 = vector.multi_reduction <add>, %4, %cst [1] : vector<1x8x32xf32> to vector<1x32xf32>
    %6 = vector.shape_cast %5 : vector<1x32xf32> to vector<1x1x32xf32>
    %7 = arith.addf %3, %6 : vector<1x1x32xf32>
    %c0_6 = arith.constant 0 : index
    %c0_7 = arith.constant 0 : index
    %c0_8 = arith.constant 0 : index
    %8 = vector.load %arg6[%c0_6, %c0_7, %c0_8] : memref<1x1x32xf32, #tpu.memory_space<vmem>>, vector<1x1x32xf32>
    tpu.vector_store %arg6[%c0_6, %c0_7, %c0_8], %7 {strides = array<i32>} : memref<1x1x32xf32, #tpu.memory_space<vmem>>, vector<1x1x32xf32>,
    %c0_i32_9 = arith.constant 0 : i32
    %9 = arith.cmpi eq, %arg1, %c0_i32_9 : i32
    %10 = arith.extui %9 : i1 to i32
    %c0_i32_10 = arith.constant 0 : i32
    %11 = arith.cmpi ne, %10, %c0_i32_10 : i32
    scf.if %11 {
      %c0_11 = arith.constant 0 : index
      %c0_12 = arith.constant 0 : index
      %c0_13 = arith.constant 0 : index
      %12 = vector.load %arg3[%c0_11, %c0_12, %c0_13] : memref<1x8x32xf32, #tpu.memory_space<vmem>>, vector<1x8x32xf32>
      %c0_14 = arith.constant 0 : index
      %c0_15 = arith.constant 0 : index
      %c0_16 = arith.constant 0 : index
      %13 = vector.load %arg6[%c0_14, %c0_15, %c0_16] : memref<1x1x32xf32, #tpu.memory_space<vmem>>, vector<1x1x32xf32>
      %14 = vector.broadcast %13 : vector<1x1x32xf32> to vector<1x8x32xf32>
      %15 = arith.mulf %12, %14 : vector<1x8x32xf32>
      %cst_17 = arith.constant dense<0.000000e+00> : vector<1x8xf32>
      %16 = vector.multi_reduction <add>, %15, %cst_17 [2] : vector<1x8x32xf32> to vector<1x8xf32>
      %17 = vector.shape_cast %16 : vector<1x8xf32> to vector<1x8x1xf32>
      %c0_18 = arith.constant 0 : index
      %c0_19 = arith.constant 0 : index
      %c0_20 = arith.constant 0 : index
      %18 = vector.load %arg2[%c0_18, %c0_19, %c0_20] : memref<1x8x1xf32, #tpu.memory_space<vmem>>, vector<1x8x1xf32>
      %19 = arith.addf %17, %18 : vector<1x8x1xf32>
      %cst_21 = arith.constant dense<0xFF800000> : vector<1x1xf32>
      %20 = vector.multi_reduction <maximumf>, %19, %cst_21 [1] : vector<1x8x1xf32> to vector<1x1xf32>
      %21 = vector.shape_cast %20 : vector<1x1xf32> to vector<1x1x1xf32>
      %22 = tpu.reciprocal %21 : vector<1x1x1xf32> -> vector<1x1x1xf32>
      %23 = vector.broadcast %22 : vector<1x1x1xf32> to vector<1x8x1xf32>
      %24 = arith.mulf %19, %23 : vector<1x8x1xf32>
      %cst_22 = arith.constant 1.000000e+00 : f32
      %25 = vector.broadcast %cst_22 : f32 to vector<1x8x1xf32>
      %26 = arith.addf %25, %24 : vector<1x8x1xf32>
      %27 = vector.broadcast %26 : vector<1x8x1xf32> to vector<1x8x32xf32>
      %28 = arith.mulf %12, %27 : vector<1x8x32xf32>
      %c0_23 = arith.constant 0 : index
      %c0_24 = arith.constant 0 : index
      %c0_25 = arith.constant 0 : index
      %29 = vector.load %arg5[%c0_23, %c0_24, %c0_25] : memref<1x8x32xf32, #tpu.memory_space<vmem>>, vector<1x8x32xf32>
      tpu.vector_store %arg5[%c0_23, %c0_24, %c0_25], %28 {strides = array<i32>} : memref<1x8x32xf32, #tpu.memory_space<vmem>>, vector<1x8x32xf32>,
    } else {
    }
    return
  }
  func.func @transform_0(%arg0: i32, %arg1: i32) -> (i32, i32, i32) {
    %c0_i32 = arith.constant 0 : i32
    %c0_i32_0 = arith.constant 0 : i32
    %c0_i32_1 = arith.constant 0 : i32
    return %arg0, %c0_i32, %c0_i32_0 : i32, i32, i32
  }
  func.func @transform_1(%arg0: i32, %arg1: i32) -> (i32, i32, i32) {
    %c0_i32 = arith.constant 0 : i32
    %c0_i32_0 = arith.constant 0 : i32
    %c0_i32_1 = arith.constant 0 : i32
    return %arg0, %c0_i32, %c0_i32_0 : i32, i32, i32
  }
  func.func @transform_2(%arg0: i32, %arg1: i32) -> (i32, i32, i32) {
    %c0_i32 = arith.constant 0 : i32
    %c0_i32_0 = arith.constant 0 : i32
    return %arg0, %arg1, %c0_i32 : i32, i32, i32
  }
  func.func @transform_3(%arg0: i32, %arg1: i32) -> (i32, i32, i32) {
    %c0_i32 = arith.constant 0 : i32
    %c0_i32_0 = arith.constant 0 : i32
    %c0_i32_1 = arith.constant 0 : i32
    return %arg0, %c0_i32, %c0_i32_0 : i32, i32, i32
  }
}

</mosaic_0001>

<bundles_post_ra>
// kernel: tpu_custom_call.1
= control target key start
LH: loop header
LB: loop body
LE: loop exit
PB: predicated region body
PF: predicated region fallthrough
CT: control target
= control target key end

     0   :  { %8 = vsyncpa [#allocation4], 0  ;;  %s776_s0 = inlined_call_operand.vmem [shape: f32[2,8,1], index: 0, kind: input, shape index: {}]   ;;  %s777_s1 = inlined_call_operand.vmem [shape: f32[2,8,32], index: 1, kind: input, shape index: {}]   ;;  %s778_s2 = inlined_call_operand.hbm [shape: f32[2,8,32], index: 2, kind: input, shape index: {}]   ;;  %s779_s3 = inlined_call_operand.hbm [shape: f32[2,8,32], index: 3, kind: output, shape index: {}]  }
   0x1   :  { %10 = vsyncpa [#allocation4 + $0x1], 0 }
   0x2   :  { %11 = vsyncpa [#allocation5], 0 }
   0x3   :  { %13 = vsyncpa [#allocation5 + $0x1], 0  ;;  %s639_s12 = smov 0   ;;  %s641_s13 = smov 0  }
   0x4   :  { %s643_s14 = smov 0   ;;  %s645_s15 = smov 0  }
   0x5   :  { %s647_s16 = smov 0   ;;  %s649_s17 = smov 0  }
   0x6 LB: > { %s420_s18 = sadd.s32 4294967295, %s615_s17   ;;  %s421_s19 = sadd.s32 4294967294, %s615_s17   ;;  %s615_s17 = sphi %s649_s17, %s19_s17   ;;  %s611_s16 = sphi %s647_s16, %s788_s16   ;;  %s607_s15 = sphi %s645_s15, %s787_s15   ;;  %s603_s14 = sphi %s643_s14, %s786_s14   ;;  %s599_s13 = sphi %s641_s13, %s785_s13   ;;  %s595_s12 = sphi %s639_s12, %s784_s12  }
   0x7   : > { %s31_s20 = sadd.s32 1, %s611_s16  ;;  %s92_s21 = sadd.s32 1, %s603_s14 }
   0x8   : > { %p33_p0 = scmp.ge.s32.totalorder %s31_s20, 2  ;;  %p99_p1 = scmp.ne.s32.totalorder %s603_s14, %s599_s13 }
   0x9   : > { %p100_p2 = scmp.eq.s32.totalorder %s615_s17, 0  ;;  %p105_p3 = scmp.ne.s32.totalorder %s599_s13, %s595_s12 }
   0xa   : > { %s790_s20 = smov (%p33_p0, %s31_s20), 0  ;;  %p106_p5 = scmp.eq.s32.totalorder %s420_s18, 0 }
   0xb   : > { %p680_p4 = por %p100_p2, %p99_p1  ;;  %s87_s23 = ssub.s32 %s611_s16, %s790_s20 }
   0xc   : > { %p129_p6 = scmp.eq.s32.totalorder %s420_s18, 1  ;;  %p90_p7 = scmp.eq.s32.totalorder %s87_s23, 0 }
   0xd   : > { %p686_p8 = por %p106_p5, %p105_p3  ;;  %p135_p10 = scmp.eq.s32.totalorder %s421_s19, 1 }
   0xe   : > { %p690_p9 = por %p129_p6, %p99_p1  ;;  %p423_p12 = scmp.ge.s32.totalorder %s615_s17, 2 }
   0xf   : > { %s695_s26 = scalar_select %p90_p7, %s603_s14, %s92_s21  }
  0x10   : > { %p697_p11 = por %p135_p10, %p105_p3  ;;  %p447_p13 = scmp.lt.s32.totalorder %s615_s17, 2 }
  0x11   : > { %s169_s28 = sand.u32 1, %s603_s14   ;;  %s425_s30 = sshll.u32 %s611_s16, 3 }
  0x12   : > { %s424_s29 = sshll.u32 %s169_s28, 3  ;;  %s178_s6 = scalar_lea.hbm %s778_s2, %s425_s30 }
  0x13   : > { %s173_s7 = scalar_lea.vmem [#allocation3], %s424_s29  ;;  %s180_s9 = sshll.u32 %s178_s6, 4  ;;  %s181_s9 = int_to_ptr.hbm [resolvable:$true] %s180_s9 }
  0x14   : > { %s182_s8 = sshll.u32 %s173_s7, 4  ;;  %p440_p0 = pnand %p447_p13, %p680_p4  ;;  %s183_s8 = int_to_ptr.vmem [resolvable:$true] %s182_s8 }
  0x15   : > { %p426_p1 = scmp.ge.s32.totalorder %s615_s17, 1  ;;  %p187_p2 = scmp.lt.s32.totalorder %s615_s17, 3 }
  0x16   : > { %s170_s10 = scalar_lea.sflag [#allocation4], %s169_s28 }
  0x17   : > { %442 = dma.hbm_to_vmem [thread:$0]  (!%p440_p0), %s181_s9, 128, %s183_s8, %s170_s10  }
  0x18   : > { %p188_p3 = pnand %p426_p1, %p187_p2 }
  0x19   : > { %s713_s11 = sand.u32 (!%p188_p3), 1, %s599_s13  }
  0x1a   : > { %191 = sbr.rel (%p188_p3) target bundleno = 331 (0x14b), region = 32  ;;  %s427_s18 = sshll.u32 (!%p188_p3), %s713_s11, 3 }
  0x1b   : > { %s194_s19 = scalar_lea.sflag (!%p188_p3), [#allocation4], %s713_s11  ;;  %s197_s21 = scalar_lea.vmem (!%p188_p3), [#allocation3], %s427_s18 }
  0x1f   : > { %586 = dma.done.wait (%p686_p8), %s194_s19, 128  }
  0x20   : > { %588 = vsyncadd (%p686_p8), %s194_s19, 4294967168  ;;  %vm241_vm0 = vcmask 253952   ;;  %v617_v0 = vmov 0.0   ;;  %vm245_vm1 = vcmask 261120   ;;  %v244_v1 = vld [vmem:[%s197_s21] sm:$0xff]  ;;  %p229_p4 = scmp.lt.s32.totalorder %s607_s15, 1 }
  0x21   : > { %242 = vst.msk [vmem:[#allocation2] sm:$0x1] %vm241_vm0, %v617_v0  ;;  %v246_v2 = vsel %vm245_vm1, %v244_v1, 0.0  ;;  %vm270_vm2 = vcmask 7168   ;;  %v618_v20 = vmov 0   ;;  %s432_s6 = sshll.u32 %s607_s15, 3 }
  0x22   : > { %v247_v3 = vrot.slane %v246_v2, 4  ;;  %s230_s22 = scalar_select %p229_p4, %s607_s15, 1  ;;  %499 = vset.pattern.permute.xlu0 %v618_v20 }
  0x23   : > { %s312_s9 = scalar_lea.hbm %s779_s3, %s432_s6  ;;  %s228_s10 = scalar_lea.vmem [#allocation6], %s427_s18 }
  0x24   : > { %v248_v4 = vadd.f32 %v247_v3, %v246_v2  ;;  %s429_s23 = sshll.u32 %s230_s22, 3  ;;  %s314_s19 = sshll.u32 %s228_s10, 4  ;;  %s315_s19 = int_to_ptr.vmem [resolvable:$true] %s314_s19 }
  0x25   : > { %s236_s29 = scalar_lea.vmem %s777_s1, %s429_s23  ;;  %s232_s5 = scalar_lea.vmem %s776_s0, %s429_s23 }
  0x26   : > { %v249_v5 = vrot.slane %v248_v4, 2  ;;  %v259_v11 = vld [vmem:[%s236_s29] sm:$0xff]  ;;  %s316_s21 = sshll.u32 %s312_s9, 4  ;;  %s302_s22 = scalar_lea.sflag [#allocation5], %s713_s11  ;;  %s317_s21 = int_to_ptr.hbm [resolvable:$true] %s316_s21 }
  0x27   : > { %v268_v15 = vld [vmem:[%s232_s5] sm:$0xff]  ;;  %s547_s23 = sshra.s32 %s317_s21, 4  ;;  %s553_s18 = scalar_lea.hbm %s779_s3, 16  ;;  %s548_s23 = int_to_ptr.hbm [resolvable:$true] %s547_s23 }
  0x28   : > { %v250_v6 = vadd.f32 %v249_v5, %v248_v4  ;;  %v243_v8 = vld [vmem:[#allocation2] sm:$0x1]  ;;  %s549_s24 = scalar_lea.hbm %s548_s23, 8  ;;  %p554_p8 = scmp.lt.s32.totalorder %s548_s23, %s779_s3 }
  0x29   : > { %p550_p5 = scmp.ne.s32.totalorder %s548_s23, %s549_s24  ;;  %p555_p10 = scmp.lt.s32.totalorder %s553_s18, %s549_s24 }
  0x2a   : > { %v251_v7 = vrot.slane %v250_v6, 1 }
  0x2b   : > { %p551_p6 = pnand %p550_p5, %p690_p9  ;;  %p556_p13 = por %p555_p10, %p554_p8 }
  0x2c   : > { %v252_v9 = vadd.f32 %v251_v7, %v250_v6 }
  0x2d   : > { %p552_p7 = pneg %p551_p6 }
  0x2e   : > { %v253_v10 = vadd.f32 %v252_v9, %v243_v8 }
  0x2f   : > { %p557_p0 = pnand %p556_p13, %p552_p7 }
  0x30   : > { %255 = vst.msk [vmem:[#allocation2] sm:$0x1] %vm241_vm0, %v253_v10 }
  0x37   : > { %v500_v12 = vld [vmem:[#allocation2] ss:$0 sm:$0xff] }
  0x38   : > { %v264_v13 = vmul.f32 %v500_v12, %v259_v11 }
  0x3a   : > { %v265_v14 = vsel %vm245_vm1, %v264_v13, 0.0 }
  0x3b   : > { %266 = vadd.xlane.f32.xlu0 %v265_v14 }
  0xae   : > { %v267_v16 = vpop.xlane.xlu0 %266 }
  0xaf   : > { %v269_v17 = vadd.f32 %v268_v15, %v267_v16 }
  0xb1   : > { %v271_v18 = vsel %vm270_vm2, %v269_v17, -inf }
  0xb2   : > { %v272_v19 = vrot.slane %v271_v18, 4 }
  0xb4   : > { %v273_v21 = vmax.f32 %v271_v18, %v272_v19 }
  0xb6   : > { %v274_v22 = vrot.slane %v273_v21, 2 }
  0xb8   : > { %v275_v23 = vmax.f32 %v273_v21, %v274_v22 }
  0xba   : > { %v276_v24 = vrot.slane %v275_v23, 1 }
  0xbc   : > { %v277_v25 = vmax.f32 %v275_v23, %v276_v24 }
  0xbe   : > { %501 = vrcp.f32 %v277_v25  ;;  %v289_v29 = vand.u32 2147483648, %v277_v25  ;;  %v287_v31 = vand.u32 2147483647, %v277_v25  ;;  %vm283_vm4 = vweird.f32 %v277_v25 }
  0xc0   : > { %v290_v33 = vor.u32 1.1754944e-38, %v289_v29  ;;  %vm288_vm6 = vcmp.eq.f32.partialorder %v287_v31, 8.507059e+37 }
  0xc4   : > { %v502_v26 = vpop.eup %501 }
  0xc5   : > { %v279_v27 = vmul.f32 %v502_v26, %v277_v25  ;;  %vm284_vm3 = vweird.f32 %v502_v26 }
  0xc6   : > { %vm285_vm5 = vmor %vm283_vm4, %vm284_vm3 }
  0xc7   : > { %v280_v28 = vsub.f32 1.0, %v279_v27 }
  0xc9   : > { %v281_v30 = vmul.f32 %v502_v26, %v280_v28 }
  0xcb   : > { %v282_v32 = vadd.f32 %v502_v26, %v281_v30 }
  0xcd   : > { %v286_v34 = vsel %vm285_vm5, %v502_v26, %v282_v32 }
  0xce   : > { %v291_v35 = vsel %vm288_vm6, %v290_v33, %v286_v34 }
  0xcf   : > { %v292_v36 = vmul.f32 %v291_v35, %v269_v17 }
  0xd1   : > { %v293_v37 = vadd.f32 1.0, %v292_v36 }
  0xd3   : > { %296 = vperm.xlu0 %499, %v293_v37  }
 0x145   : > { %v297_v38 = vpop.permute.xlu0 %296 }
 0x146   : > { %v299_v39 = vmul.f32 %v297_v38, %v259_v11 }
 0x148   : > { %300 = vst.msk [vmem:[%s228_s10] sm:$0xff] %vm245_vm1, %v299_v39 }
 0x149   : > { %560 = shalt.err (!%p557_p0)
}
 0x14a   : > { %437 = dma.vmem_to_hbm [thread:$0]  (%p690_p9), %s315_s19, 128, %s317_s21, %s302_s22  }
 0x14b PF: > { %s328_s11 = sand.u32 1, %s595_s12   ;;  %p444_p1 = pnand %p423_p12, %p697_p11 }
 0x14c   : > { %s329_s4 = scalar_lea.sflag [#allocation5], %s328_s11 }
 0x14d   : > { %p445_p2 = pneg %p444_p1 }
 0x14f   : > { %590 = dma.done.wait (%p445_p2), %s329_s4, 128  }
 0x150   : > { %592 = vsyncadd (%p445_p2), %s329_s4, 4294967168  ;;  %s19_s17 = sadd.s32 1, %s615_s17   ;;  %s784_s12 = smov %s599_s13 }
 0x151   : > { %p16_p3 = scmp.ge.s32.totalorder %s19_s17, 4   ;;  %s785_s13 = smov %s603_s14 }
 0x152   : > { %s786_s14 = smov %s695_s26  ;;  %s787_s15 = smov %s611_s16 }
 0x153   : > { %s788_s16 = smov %s790_s20  ;;  %18 = sbr.rel (!%p16_p3) target bundleno = 6 (0x6), region = 91 }
 0x158   :  { %335 = vsyncpa [#allocation4], 1 }
 0x159   :  { %337 = vsyncpa [#allocation4 + $0x1], 1 }
 0x15a   :  { %338 = vsyncpa [#allocation5], 1 }
 0x15b   :  { %340 = vsyncpa [#allocation5 + $0x1], 1 }

</bundles_post_ra>
